<compile_context>
chip_gen: v7x
topology: tpu7x:2x2x1
jax: 0.10.0
libtpu: 0.0.40
codegen_flags: <defaults>
</compile_context>

<pallas_src>
import functools

import jax
import jax.numpy as jnp
import numpy as np
from jax.experimental import pallas as pl
from jax.experimental.pallas import tpu as pltpu


def _round_up(n, m):
    return ((n + m - 1) // m) * m


def _tpu_generation():
    """Best-effort TPU generation tag: 'v5', 'v6', 'v7', or None."""
    try:
        kind = jax.devices()[0].device_kind.lower()
    except Exception:
        return None
    for g in ("v7", "v6", "v5"):
        if g in kind:
            return g
    return None


def _default_use_bf16():
    # bf16 MXU operands + bf16 tanh pay off on v6e/v7x (bf16-native MXU, bf16
    # EUP).  v5e has no bf16 VPU/EUP, so bf16 would only add conversion cost.
    return _tpu_generation() in ("v6", "v7")


def _additive_attention_kernel(x_ref, mask_ref, w1_ref, b1_ref, w2_ref,
                               b2_ref, o_ref, *, compute_dtype):
    # x_ref:    (TB, S, D)  batch tile (f32)
    # mask_ref: (TB, S)     attention mask tile (lane-dense, f32)
    # w1_ref:   (D, H)      fc1 weight (pre-transposed), in compute_dtype
    # b1_ref:   (1, H)      fc1 bias (f32)
    # w2_ref:   (1, H)      fc2 weight row (f32)
    # b2_ref:   (1, 1)      fc2 bias, SMEM scalar
    # o_ref:    (TB, D)     pooled output tile
    TB, S, D = x_ref.shape
    H = w1_ref.shape[1]

    x = x_ref[...]                                    # (TB, S, D) f32
    x2 = x.reshape(TB * S, D)                         # layout no-op (S % 8 == 0)

    # fc1: one batched MXU matmul (bf16 operands on v6e/v7x), f32 accumulate.
    e = jnp.dot(x2.astype(compute_dtype), w1_ref[...],
                preferred_element_type=jnp.float32) + b1_ref[...]
    # tanh over (TB*S, H) is the EUP-heavy step; run it in the compute dtype.
    e = jnp.tanh(e.astype(compute_dtype)).astype(jnp.float32)

    # fc2 (N=1 matmul) as VPU multiply + XLU lane reduction.
    e3 = e.reshape(TB, S, H)
    scores = jnp.sum(e3 * w2_ref[...][None], axis=-1)        # (TB, S) f32

    # exp of raw logits, then mask -- same semantics as the torch module.
    alpha = jnp.exp(scores + b2_ref[0, 0]) * mask_ref[...]   # (TB, S)

    # Pool with the UNnormalized weights, then normalize the pooled result
    # with one reciprocal per row + a VPU multiply (no broadcast divide).
    denom = jnp.sum(alpha, axis=-1, keepdims=True) + 1e-8    # (TB, 1)
    inv = pl.reciprocal(denom, approx=False)
    pooled = jnp.sum(x * alpha[:, :, None], axis=1)          # (TB, D)
    o_ref[...] = (pooled * inv).astype(o_ref.dtype)


def additive_attention(x, w1_t, b1, w2, b2, attn_mask=None,
                       rows_per_step=2048, use_bf16=None):
    """x: (B, S, D); attn_mask: (B, S) or None. Returns (B, D) f32.

    w1_t: (D, H) = torch fc1.weight.T; b1: (H,); w2: (1, H) = torch fc2.weight;
    b2: (1,) = torch fc2.bias.
    """
    B, S, D = x.shape
    H = w1_t.shape[1]
    if use_bf16 is None:
        use_bf16 = _default_use_bf16()
    compute_dtype = jnp.bfloat16 if use_bf16 else jnp.float32
    gen = _tpu_generation()

    x = x.astype(jnp.float32)
    if attn_mask is None:
        attn_mask = jnp.ones((B, S), dtype=jnp.float32)
    mask = attn_mask.astype(jnp.float32)

    # Pad S to a sublane multiple so in-kernel reshapes are layout no-ops.
    # The zero mask (and zero x) on padded rows keeps the math unchanged.
    s_pad = _round_up(S, 8)
    if s_pad != S:
        x = jnp.pad(x, ((0, 0), (0, s_pad - S), (0, 0)))
        mask = jnp.pad(mask, ((0, 0), (0, s_pad - S)))

    # ---- batch-tile (tb) selection --------------------------------------
    h_pad = _round_up(H, 128)
    e_item = 2 if use_bf16 else 4
    # Dominant per-batch-row VMEM bytes: double-buffered x + mask blocks, the
    # casted x2 copy, the f32 fc1 accumulator, and the tanh output.
    per_row = s_pad * (2 * D * 4 + 2 * 4 + D * e_item
                       + h_pad * 4 + h_pad * e_item)
    per_row += 2 * D * 4                           # double-buffered output block
    fixed = 2 * (D * h_pad * 4 + 2 * h_pad * 4)    # resident weights / biases
    # v7x has only 64 MiB physical VMEM (32 MiB scoped default); keep headroom.
    vmem_budget = (24 << 20) if gen == "v7" else (64 << 20)
    tb_vmem = max(1, (vmem_budget - fixed) // per_row)
    cap_rows = max(1, rows_per_step // s_pad)      # target tb*S rows per step
    tb = int(min(cap_rows, tb_vmem))

    if tb >= B:
        tb = B                                     # single block == full batch
    else:
        tb = max(8, (tb // 8) * 8)                 # sublane-legal block size
    num_blocks = -(-B // tb)

    # On v7x (2 TensorCores) make sure the "parallel" axis has >= 2 blocks.
    if gen == "v7" and num_blocks == 1 and B >= 16:
        tb = max(8, ((-(-B // 2)) // 8) * 8)
        num_blocks = -(-B // tb)

    b_pad = num_blocks * tb
    if b_pad != B:
        x = jnp.pad(x, ((0, b_pad - B), (0, 0), (0, 0)))
        mask = jnp.pad(mask, ((0, b_pad - B), (0, 0)))   # zero mask -> zero out

    w1_c = w1_t.astype(compute_dtype)                    # (D, H) MXU operand
    b1_2d = b1.reshape(1, H).astype(jnp.float32)
    w2_2d = w2.reshape(1, H).astype(jnp.float32)
    b2_2d = b2.reshape(1, 1).astype(jnp.float32)

    cost = pl.CostEstimate(
        flops=2 * B * S * D * H + 2 * B * S * H + 2 * B * S * D,
        transcendentals=B * S * (H + 1),
        bytes_accessed=(b_pad * s_pad * (D + 1) * 4      # x + mask in
                        + D * H * e_item + (2 * H + 1) * 4
                        + b_pad * D * 4),                # out
    )

    kernel = functools.partial(_additive_attention_kernel,
                               compute_dtype=compute_dtype)

    out = pl.pallas_call(
        kernel,
        out_shape=jax.ShapeDtypeStruct((b_pad, D), jnp.float32),
        grid_spec=pltpu.PrefetchScalarGridSpec(
            num_scalar_prefetch=0,
            grid=(num_blocks,),
            in_specs=[
                pl.BlockSpec((tb, s_pad, D), lambda b: (b, 0, 0)),   # x tile
                pl.BlockSpec((tb, s_pad), lambda b: (b, 0)),          # mask tile
                pl.BlockSpec((D, H), lambda b: (0, 0)),               # W1^T (resident)
                pl.BlockSpec((1, H), lambda b: (0, 0)),               # b1   (resident)
                pl.BlockSpec((1, H), lambda b: (0, 0)),               # W2   (resident)
                pl.BlockSpec(memory_space=pltpu.MemorySpace.SMEM),    # b2 scalar
            ],
            out_specs=pl.BlockSpec((tb, D), lambda b: (b, 0)),
        ),
        compiler_params=pltpu.CompilerParams(
            dimension_semantics=("parallel",),
            vmem_limit_bytes=(48 << 20) if gen == "v7" else (100 << 20)),
        cost_estimate=cost,
    )(x, mask, w1_c, b1_2d, w2_2d, b2_2d)
    return out[:B]


def additive_attention_ref(x, w1_t, b1, w2, b2, attn_mask=None):
    """Pure-JAX reference mirroring the PyTorch forward."""
    e = jnp.tanh(x @ w1_t + b1)                                # (B, S, H)
    alpha = jnp.exp(e @ w2.reshape(-1, 1) + b2.reshape(1, 1))  # (B, S, 1)
    if attn_mask is not None:
        alpha = alpha * attn_mask[:, :, None]
    alpha = alpha / (jnp.sum(alpha, axis=1, keepdims=True) + 1e-8)
    return jnp.einsum('bsd,bso->bd', x, alpha)                 # bmm(x^T, alpha)


if __name__ == "__main__":
    key = jax.random.PRNGKey(0)

    # ---- test 1: module-sized shapes, exact f32 path, tight tolerance ----
    B, S, D, H = 2, 8, 32, 200   # batch, candidate_size, d_h, hidden_size
    k_x, k_w1, k_b1, k_w2, k_b2, k_m = jax.random.split(key, 6)
    x = jax.random.normal(k_x, (B, S, D), dtype=jnp.float32)
    # Torch-layout parameters: fc1.weight (H, D), fc1.bias (H,),
    # fc2.weight (1, H), fc2.bias (1,).
    w1 = jax.random.normal(k_w1, (H, D), dtype=jnp.float32) * 0.1
    b1 = jax.random.normal(k_b1, (H,), dtype=jnp.float32) * 0.1
    w2 = jax.random.normal(k_w2, (1, H), dtype=jnp.float32) * 0.1
    b2 = jax.random.normal(k_b2, (1,), dtype=jnp.float32) * 0.1
    attn_mask = (jax.random.uniform(k_m, (B, S)) > 0.2).astype(jnp.float32)
    w1_t = w1.T   # (D, H)

    ref = additive_attention_ref(x, w1_t, b1, w2, b2, attn_mask)

    out_f32 = additive_attention(x, w1_t, b1, w2, b2, attn_mask,
                                 use_bf16=False)
    out_f32 = jax.block_until_ready(out_f32)
    np.testing.assert_allclose(np.asarray(out_f32), np.asarray(ref),
                               rtol=1e-5, atol=1e-5)

    # Device-tuned path (bf16 matmul + tanh on v6e/v7x); looser tolerance when
    # bf16 is active, tight otherwise.
    out = additive_attention(x, w1_t, b1, w2, b2, attn_mask)
    out = jax.block_until_ready(out)
    tol = 5e-2 if _default_use_bf16() else 1e-5
    np.testing.assert_allclose(np.asarray(out), np.asarray(ref),
                               rtol=tol, atol=tol)
    assert out.shape == (B, D)

    # ---- test 2: unaligned S and multi-block batch (forced small tiles) ----
    B2, S2 = 20, 7
    k_x2, k_m2 = jax.random.split(jax.random.PRNGKey(1), 2)
    x2 = jax.random.normal(k_x2, (B2, S2, D), dtype=jnp.float32)
    mask2 = (jax.random.uniform(k_m2, (B2, S2)) > 0.2).astype(jnp.float32)
    ref2 = additive_attention_ref(x2, w1_t, b1, w2, b2, mask2)
    out2 = additive_attention(x2, w1_t, b1, w2, b2, mask2,
                              rows_per_step=64, use_bf16=False)
    out2 = jax.block_until_ready(out2)
    np.testing.assert_allclose(np.asarray(out2), np.asarray(ref2),
                               rtol=1e-5, atol=1e-5)
    assert out2.shape == (B2, D)

    print("KERNEL_OK")
</pallas_src>

<mosaic_0001>
module attributes {stable_mosaic.version = 11 : i64} {
  func.func @_additive_attention_kernel(%arg0: i32, %arg1: memref<2x8x32xf32, #tpu.memory_space<vmem>>, %arg2: memref<2x8xf32, #tpu.memory_space<vmem>>, %arg3: memref<32x200xf32, #tpu.memory_space<vmem>>, %arg4: memref<1x200xf32, #tpu.memory_space<vmem>>, %arg5: memref<1x200xf32, #tpu.memory_space<vmem>>, %arg6: memref<1x1xf32, #tpu.memory_space<smem>>, %arg7: memref<2x32xf32, #tpu.memory_space<vmem>>) attributes {dimension_semantics = [#tpu.dimension_semantics<parallel>], iteration_bounds = array<i64: 1>, scalar_prefetch = 0 : i64, scratch_operands = 0 : i64, tpu.core_type = #tpu.core_type<tc>, window_params = [{transform_indices = @transform_0, window_bounds = array<i64: 2, 8, 32>}, {transform_indices = @transform_1, window_bounds = array<i64: 2, 8>}, {pipeline_mode = #tpu.pipeline_mode<synchronous>, transform_indices = @transform_2, window_bounds = array<i64: 32, 200>}, {pipeline_mode = #tpu.pipeline_mode<synchronous>, transform_indices = @transform_3, window_bounds = array<i64: 1, 200>}, {pipeline_mode = #tpu.pipeline_mode<synchronous>, transform_indices = @transform_4, window_bounds = array<i64: 1, 200>}, {transform_indices = @transform_5, window_bounds = array<i64: 1, 1>}, {transform_indices = @transform_6, window_bounds = array<i64: 2, 32>}]} {
    %c0 = arith.constant 0 : index
    %c0_0 = arith.constant 0 : index
    %c0_1 = arith.constant 0 : index
    %0 = vector.load %arg1[%c0, %c0_0, %c0_1] : memref<2x8x32xf32, #tpu.memory_space<vmem>>, vector<2x8x32xf32>
    %1 = vector.shape_cast %0 : vector<2x8x32xf32> to vector<16x32xf32>
    %c0_2 = arith.constant 0 : index
    %c0_3 = arith.constant 0 : index
    %2 = vector.load %arg3[%c0_2, %c0_3] : memref<32x200xf32, #tpu.memory_space<vmem>>, vector<32x200xf32>
    %cst = arith.constant dense<0.000000e+00> : vector<16x200xf32>
    %3 = tpu.matmul %1, %2, %cst {dimension_numbers = #tpu.dot_dimension_numbers<[1], [0], [0], [1], [0, 0, 1, 1], [], []>} : vector<16x32xf32>, vector<32x200xf32>, vector<16x200xf32> -> vector<16x200xf32>
    %c0_4 = arith.constant 0 : index
    %c0_5 = arith.constant 0 : index
    %4 = vector.load %arg4[%c0_4, %c0_5] : memref<1x200xf32, #tpu.memory_space<vmem>>, vector<1x200xf32>
    %5 = vector.broadcast %4 : vector<1x200xf32> to vector<16x200xf32>
    %6 = arith.addf %3, %5 : vector<16x200xf32>
    %7 = math.tanh %6 : vector<16x200xf32>
    %8 = vector.shape_cast %7 : vector<16x200xf32> to vector<2x8x200xf32>
    %c0_6 = arith.constant 0 : index
    %c0_7 = arith.constant 0 : index
    %9 = vector.load %arg5[%c0_6, %c0_7] : memref<1x200xf32, #tpu.memory_space<vmem>>, vector<1x200xf32>
    %10 = vector.shape_cast %9 : vector<1x200xf32> to vector<1x1x200xf32>
    %11 = vector.broadcast %10 : vector<1x1x200xf32> to vector<2x8x200xf32>
    %12 = arith.mulf %8, %11 : vector<2x8x200xf32>
    %cst_8 = arith.constant dense<0.000000e+00> : vector<2x8xf32>
    %13 = vector.multi_reduction <add>, %12, %cst_8 [2] : vector<2x8x200xf32> to vector<2x8xf32>
    %c0_9 = arith.constant 0 : index
    %c0_10 = arith.constant 0 : index
    %14 = memref.load %arg6[%c0_9, %c0_10] : memref<1x1xf32, #tpu.memory_space<smem>>
    %15 = vector.broadcast %14 : f32 to vector<2x8xf32>
    %16 = arith.addf %13, %15 : vector<2x8xf32>
    %17 = math.exp %16 : vector<2x8xf32>
    %c0_11 = arith.constant 0 : index
    %c0_12 = arith.constant 0 : index
    %18 = vector.load %arg2[%c0_11, %c0_12] : memref<2x8xf32, #tpu.memory_space<vmem>>, vector<2x8xf32>
    %19 = arith.mulf %17, %18 : vector<2x8xf32>
    %cst_13 = arith.constant dense<0.000000e+00> : vector<2xf32>
    %20 = vector.multi_reduction <add>, %19, %cst_13 [1] : vector<2x8xf32> to vector<2xf32>
    %21 = vector.shape_cast %20 : vector<2xf32> to vector<2x1xf32>
    %cst_14 = arith.constant 9.99999993E-9 : f32
    %22 = vector.broadcast %cst_14 : f32 to vector<2x1xf32>
    %23 = arith.addf %21, %22 : vector<2x1xf32>
    %24 = tpu.reciprocal %23 : vector<2x1xf32> -> vector<2x1xf32>
    %25 = vector.shape_cast %19 : vector<2x8xf32> to vector<2x8x1xf32>
    %26 = vector.broadcast %25 : vector<2x8x1xf32> to vector<2x8x32xf32>
    %27 = arith.mulf %0, %26 : vector<2x8x32xf32>
    %cst_15 = arith.constant dense<0.000000e+00> : vector<2x32xf32>
    %28 = vector.multi_reduction <add>, %27, %cst_15 [1] : vector<2x8x32xf32> to vector<2x32xf32>
    %29 = vector.broadcast %24 : vector<2x1xf32> to vector<2x32xf32>
    %30 = arith.mulf %28, %29 : vector<2x32xf32>
    %c0_16 = arith.constant 0 : index
    %c0_17 = arith.constant 0 : index
    %31 = vector.load %arg7[%c0_16, %c0_17] : memref<2x32xf32, #tpu.memory_space<vmem>>, vector<2x32xf32>
    tpu.vector_store %arg7[%c0_16, %c0_17], %30 {strides = array<i32>} : memref<2x32xf32, #tpu.memory_space<vmem>>, vector<2x32xf32>,
    return
  }
  func.func @transform_0(%arg0: i32) -> (i32, i32, i32) {
    %c0_i32 = arith.constant 0 : i32
    %c0_i32_0 = arith.constant 0 : i32
    %c0_i32_1 = arith.constant 0 : i32
    return %arg0, %c0_i32, %c0_i32_0 : i32, i32, i32
  }
  func.func @transform_1(%arg0: i32) -> (i32, i32) {
    %c0_i32 = arith.constant 0 : i32
    %c0_i32_0 = arith.constant 0 : i32
    return %arg0, %c0_i32 : i32, i32
  }
  func.func @transform_2(%arg0: i32) -> (i32, i32) {
    %c0_i32 = arith.constant 0 : i32
    %c0_i32_0 = arith.constant 0 : i32
    %c0_i32_1 = arith.constant 0 : i32
    return %c0_i32, %c0_i32_0 : i32, i32
  }
  func.func @transform_3(%arg0: i32) -> (i32, i32) {
    %c0_i32 = arith.constant 0 : i32
    %c0_i32_0 = arith.constant 0 : i32
    %c0_i32_1 = arith.constant 0 : i32
    return %c0_i32, %c0_i32_0 : i32, i32
  }
  func.func @transform_4(%arg0: i32) -> (i32, i32) {
    %c0_i32 = arith.constant 0 : i32
    %c0_i32_0 = arith.constant 0 : i32
    %c0_i32_1 = arith.constant 0 : i32
    return %c0_i32, %c0_i32_0 : i32, i32
  }
  func.func @transform_5(%arg0: i32) -> (i32, i32) {
    %c0_i32 = arith.constant 0 : i32
    %c0_i32_0 = arith.constant 0 : i32
    %c0_i32_1 = arith.constant 0 : i32
    return %c0_i32, %c0_i32_0 : i32, i32
  }
  func.func @transform_6(%arg0: i32) -> (i32, i32) {
    %c0_i32 = arith.constant 0 : i32
    %c0_i32_0 = arith.constant 0 : i32
    return %arg0, %c0_i32 : i32, i32
  }
}

</mosaic_0001>

<bundles_post_ra>
// kernel: tpu_custom_call.1
= control target key start
LH: loop header
LB: loop body
LE: loop exit
PB: predicated region body
PF: predicated region fallthrough
CT: control target
= control target key end

     0   :  { %12 = vsyncpa [#allocation4], 0  ;;  %s643_s0 = inlined_call_operand.hbm [shape: f32[2,8,32], index: 0, kind: input, shape index: {}]   ;;  %s644_s1 = inlined_call_operand.hbm [shape: f32[2,8], index: 1, kind: input, shape index: {}]   ;;  %s645_s2 = inlined_call_operand.hbm [shape: f32[32,200], index: 2, kind: input, shape index: {}]   ;;  %s646_s3 = inlined_call_operand.hbm [shape: f32[1,200], index: 3, kind: input, shape index: {}]   ;;  %s647_s4 = inlined_call_operand.hbm [shape: f32[1,200], index: 4, kind: input, shape index: {}]   ;;  %s648_s5 = inlined_call_operand.<no memory space> [shape: f32[1,1], index: 5, kind: input, shape index: {}]   ;;  %s649_s6 = inlined_call_operand.hbm [shape: f32[2,32], index: 6, kind: output, shape index: {}]  }
   0x1   :  { %13 = vsyncpa [#allocation7], 0 }
   0x2   :  { %14 = vsyncpa [#allocation10], 0 }
   0x3   :  { %15 = vsyncpa [#allocation5], 0  ;;  %s507_s21 = smov [#allocation6]   ;;  %s508_s23 = smov [#allocation9]  }
   0x4   :  { %s34_s22 = sshll.u32 %s507_s21, 4  ;;  %s56_s24 = sshll.u32 %s508_s23, 4  ;;  %s35_s22 = int_to_ptr.vmem [resolvable:$true] %s34_s22  ;;  %s57_s24 = int_to_ptr.vmem [resolvable:$true] %s56_s24 }
   0x5   :  { %s367_s27 = scalar_lea.hbm %s644_s1, 32 }
   0x6   :  { %p368_p0 = scmp.ne.s32.totalorder %s644_s1, %s367_s27  ;;  %p371_p1 = scmp.lt.u32.totalorder %s367_s27, %s644_s1 }
   0x8   :  { %p373_p2 = pnand %p371_p1, %p368_p0 }
   0xa   :  { %376 = shalt.err (!%p373_p2)
}
   0xb   :  { %s377_s8 = scalar_lea.vmem %s35_s22, 32  ;;  %p382_p4 = scmp.lt.s32.totalorder %s35_s22, %s35_s22 }
   0xc   :  { %p378_p3 = scmp.ne.s32.totalorder %s35_s22, %s377_s8  ;;  %p383_p5 = scmp.lt.s32.totalorder %s377_s8, %s377_s8 }
   0xe   :  { %p384_p6 = por %p383_p5, %p382_p4 }
  0x10   :  { %p385_p7 = pnand %p384_p6, %p378_p3 }
  0x12   :  { %388 = shalt.err (!%p385_p7)
}
  0x13   :  { %37 = dma.hbm_to_vmem [thread:$0]  %s644_s1, 32, %s35_s22, [#allocation7]  }
  0x14   :  { %s389_s13 = scalar_lea.hbm %s646_s3, 32 }
  0x15   :  { %p390_p8 = scmp.ne.s32.totalorder %s646_s3, %s389_s13  ;;  %p393_p9 = scmp.lt.u32.totalorder %s389_s13, %s646_s3 }
  0x17   :  { %p395_p10 = pnand %p393_p9, %p390_p8 }
  0x19   :  { %398 = shalt.err (!%p395_p10)
}
  0x1a   :  { %s399_s18 = scalar_lea.vmem %s57_s24, 32  ;;  %p404_p12 = scmp.lt.s32.totalorder %s57_s24, %s57_s24 }
  0x1b   :  { %p400_p11 = scmp.ne.s32.totalorder %s57_s24, %s399_s18  ;;  %p405_p13 = scmp.lt.s32.totalorder %s399_s18, %s399_s18 }
  0x1d   :  { %p406_p0 = por %p405_p13, %p404_p12 }
  0x1f   :  { %p407_p1 = pnand %p406_p0, %p400_p11 }
  0x21   :  { %410 = shalt.err (!%p407_p1)
}
  0x22   :  { %59 = dma.hbm_to_vmem [thread:$0]  %s646_s3, 32, %s57_s24, [#allocation10]  }
  0x23   :  { %s509_s20 = smov [#allocation3]   ;;  %s411_s25 = scalar_lea.hbm %s643_s0, 256 }
  0x24   :  { %s21_s21 = sshll.u32 %s509_s20, 4  ;;  %p412_p2 = scmp.ne.s32.totalorder %s643_s0, %s411_s25  ;;  %s22_s21 = int_to_ptr.vmem [resolvable:$true] %s21_s21 }
  0x25   :  { %p415_p3 = scmp.lt.u32.totalorder %s411_s25, %s643_s0 }
  0x27   :  { %p417_p4 = pnand %p415_p3, %p412_p2 }
  0x29   :  { %420 = shalt.err (!%p417_p4)
}
  0x2a   :  { %s421_s30 = scalar_lea.vmem %s22_s21, 256  ;;  %p426_p6 = scmp.lt.s32.totalorder %s22_s21, %s22_s21 }
  0x2b   :  { %p422_p5 = scmp.ne.s32.totalorder %s22_s21, %s421_s30  ;;  %p427_p7 = scmp.lt.s32.totalorder %s421_s30, %s421_s30 }
  0x2d   :  { %p428_p8 = por %p427_p7, %p426_p6 }
  0x2f   :  { %p429_p9 = pnand %p428_p8, %p422_p5 }
  0x31   :  { %432 = shalt.err (!%p429_p9)
}
  0x32   :  { %s510_s3 = smov 128   ;;  %s511_s24 = smov 8  }
  0x33   :  { %27 = dma.hbm_to_vmem [thread:$0]  %s643_s0, 256, %s22_s21, [#allocation4], %s510_s3, %s510_s3, %s511_s24  }
  0x34   :  { %s512_s9 = smov [#allocation8]   ;;  %s433_s13 = scalar_lea.hbm %s645_s2, 1024 }
  0x35   :  { %s43_s10 = sshll.u32 %s512_s9, 4  ;;  %p434_p10 = scmp.ne.s32.totalorder %s645_s2, %s433_s13  ;;  %s44_s10 = int_to_ptr.vmem [resolvable:$true] %s43_s10 }
  0x36   :  { %p437_p11 = scmp.lt.u32.totalorder %s433_s13, %s645_s2 }
  0x38   :  { %p439_p12 = pnand %p437_p11, %p434_p10 }
  0x3a   :  { %442 = shalt.err (!%p439_p12)
}
  0x3b   :  { %s443_s18 = scalar_lea.vmem %s44_s10, 1024  ;;  %p448_p0 = scmp.lt.s32.totalorder %s44_s10, %s44_s10 }
  0x3c   :  { %p444_p13 = scmp.ne.s32.totalorder %s44_s10, %s443_s18  ;;  %p449_p1 = scmp.lt.s32.totalorder %s443_s18, %s443_s18 }
  0x3e   :  { %p450_p2 = por %p449_p1, %p448_p0 }
  0x40   :  { %p451_p3 = pnand %p450_p2, %p444_p13 }
  0x42   :  { %454 = shalt.err (!%p451_p3)
}
  0x43   :  { %s513_s0 = smov 256   ;;  %s514_s1 = smov 16  }
  0x44   :  { %49 = dma.hbm_to_vmem [thread:$0]  %s645_s2, 1024, %s44_s10, [#allocation7], %s513_s0, %s513_s0, %s514_s1  }
  0x45   :  { %s515_s21 = smov [#allocation11]   ;;  %s455_s26 = scalar_lea.hbm %s647_s4, 32 }
  0x46   :  { %s66_s22 = sshll.u32 %s515_s21, 4  ;;  %p456_p4 = scmp.ne.s32.totalorder %s647_s4, %s455_s26  ;;  %s67_s22 = int_to_ptr.vmem [resolvable:$true] %s66_s22 }
  0x47   :  { %p459_p5 = scmp.lt.u32.totalorder %s455_s26, %s647_s4 }
  0x49   :  { %p461_p6 = pnand %p459_p5, %p456_p4 }
  0x4b   :  { %464 = shalt.err (!%p461_p6)
}
  0x4c   :  { %s465_s3 = scalar_lea.vmem %s67_s22, 32  ;;  %p470_p8 = scmp.lt.s32.totalorder %s67_s22, %s67_s22 }
  0x4d   :  { %p466_p7 = scmp.ne.s32.totalorder %s67_s22, %s465_s3  ;;  %p471_p9 = scmp.lt.s32.totalorder %s465_s3, %s465_s3 }
  0x4f   :  { %p472_p10 = por %p471_p9, %p470_p8 }
  0x51   :  { %p473_p11 = pnand %p472_p10, %p466_p7 }
  0x53   :  { %476 = shalt.err (!%p473_p11)
}
  0x54   :  { %69 = dma.hbm_to_vmem [thread:$0]  %s647_s4, 32, %s67_s22, [#allocation10]  }
  0x55   :  { %499 = dma.done.wait [#allocation4], 256  }
  0x56   :  { %500 = vsyncadd [#allocation4], 4294967040 }
  0x57   :  { %501 = dma.done.wait [#allocation7], 1056  }
  0x58   :  { %502 = vsyncadd [#allocation7], 4294966240 }
  0x59   :  { %503 = dma.done.wait [#allocation10], 64  }
  0x5a   :  { %504 = vsyncadd [#allocation10], 4294967232  ;;  %v516_v0 = vmov 0.0   ;;  %v90_v1 = vld [vmem:[#allocation8 + $0x8] sm:$0xff]  ;;  %v92_v2 = vld [vmem:[#allocation8 + $0x18] sm:$0xff]  ;;  %vm109_vm0 = vcmask 261120   ;;  %v99_v15 = vlaneseq  ;;  %v223_v49 = vstv %s648_s5 }
  0x5b   :  { %180 = vmatprep.mubr.f32.mxu0 %v516_v0  ;;  %186 = vmatprep.mubr.f32.mxu1 %v516_v0  ;;  %v89_v3 = vld [vmem:[#allocation8] sm:$0xff]  ;;  %v327_v4 = vpack.c.bf16 %v92_v2, %v90_v1  ;;  %v91_v5 = vld [vmem:[#allocation8 + $0x10] sm:$0xff]  ;;  %v94_v6 = vld [vmem:[#allocation8 + $0x28] sm:$0xff]  ;;  %vm213_vm1 = vcmask 588800   ;;  %v517_v48 = vmov 0   ;;  %vm268_vm2 = vcmask 1041409  }
  0x5c   :  { %v96_v7 = vld [vmem:[#allocation8 + $0x38] sm:$0xff]  ;;  %v329_v8 = vpack.c.bf16 %v91_v5, %v89_v3  ;;  %v93_v10 = vld [vmem:[#allocation8 + $0x20] sm:$0xff]  ;;  %v95_v11 = vld [vmem:[#allocation8 + $0x30] sm:$0xff]  ;;  %v100_v16 = vshrl.u32 %v99_v15, 7  ;;  %351 = vset.pattern.permute.xlu0 %v517_v48  ;;  %352 = vset.pattern.permute.xlu1 %v517_v48  ;;  %v259_v62 = vand.u32 127, %v99_v15  ;;  %vm271_vm3 = vcmask 58368  }
  0x5d   :  { %v331_v9 = vpack.c.bf16 %v96_v7, %v94_v6  ;;  %328 = vmatprep.subr.bf16.mxu0 %v327_v4  ;;  %335 = vmatprep.subr.bf16.mxu1 %v327_v4  ;;  %v333_v12 = vpack.c.bf16 %v95_v11, %v93_v10  ;;  %v614_v13 = vld [vmem:[#allocation3] sm:$0xff]  ;;  %v616_v14 = vld [vmem:[#allocation3 + $0x8] sm:$0xff]  ;;  %v230_v18 = vld [vmem:[#allocation6] sm:$0x3]  ;;  %s518_s5 = smov [#allocation12]   ;;  %vm306_vm4 = vcmask 254976  }
  0x5e   :  { %330 = vmatpush1.bf16.msra.mxu0 %v329_v8  ;;  %337 = vmatpush1.bf16.msra.mxu1 %v329_v8  ;;  %v101_v17 = vsub.s32 0, %v100_v16  ;;  %v105_v19 = vsub.s32 1, %v100_v16  ;;  %v97_v22 = vld [vmem:[#allocation9] sm:$0x3]  ;;  %v197_v33 = vld [vmem:[#allocation11] sm:$0x3]  ;;  %v262_v63 = vsub.s32 %v259_v62, %v100_v16 }
  0x5f   :  { %332 = vmatprep.subr.bf16.mxu0 %v331_v9  ;;  %336 = vmatprep.subr.bf16.mxu1 %v331_v9  ;;  %s314_s8 = sshll.u32 %s518_s5, 4  ;;  %s315_s8 = int_to_ptr.vmem [resolvable:$true] %s314_s8 }
  0x60   :  { %v235_v20 = vrot.slane %v230_v18, %v101_v17  ;;  %v242_v21 = vrot.slane %v230_v18, %v105_v19  ;;  %v102_v23 = vrot.slane %v97_v22, %v101_v17  ;;  %v106_v24 = vrot.slane %v97_v22, %v105_v19  ;;  %s477_s9 = scalar_lea.vmem %s315_s8, 32  ;;  %p482_p13 = scmp.lt.s32.totalorder %s315_s8, %s315_s8 }
  0x61   :  { %v206_v34 = vrot.slane %v197_v33, %v105_v19  ;;  %v202_v35 = vrot.slane %v197_v33, %v101_v17  ;;  %p478_p12 = scmp.ne.s32.totalorder %s315_s8, %s477_s9  ;;  %p483_p0 = scmp.lt.s32.totalorder %s477_s9, %s477_s9 }
  0x62   :  { %334 = vmatpush1.bf16.msra.mxu0 %v333_v12  ;;  %338 = vmatpush1.bf16.msra.mxu1 %v333_v12 }
  0x63   :  { %237 = vbcast.lane.b32.xlu1 %v235_v20, 256  ;;  %p484_p1 = por %p483_p0, %p482_p13 }
  0x65   :  { %325 = vmatmul.mubr.msk.f32.vlgmr.msra.gmra.mrb[0].mxu0 %vm109_vm0, %v614_v13  ;;  %326 = vmatmul.mubr.msk.f32.vlgmr.msra.gmra.mrb[0].mxu1 %vm109_vm0, %v616_v14  ;;  %p485_p2 = pnand %p484_p1, %p478_p12 }
  0x67   :  { %244 = vbcast.lane.b32.xlu1 %v242_v21, 256 }
  0xd5   :  { %v238_v56 = vpop.permute.xlu1 %237 }
  0xd9   :  { %v245_v59 = vpop.permute.xlu1 %244 }
 0x138   :  { %v182_v25 = vpop.f32.mrb[0].mxu0  ;;  %v188_v26 = vpop.f32.mrb[0].mxu1 }
 0x139   :  { %v183_v27 = vadd.f32 %v182_v25, %v102_v23  ;;  %v184_v28 = vpop.f32.mrb[1].mxu0  ;;  %v189_v29 = vadd.f32 %v188_v26, %v102_v23  ;;  %v190_v30 = vpop.f32.mrb[1].mxu1 }
 0x13a   :  { %v185_v31 = vadd.f32 %v184_v28, %v106_v24  ;;  %v191_v32 = vadd.f32 %v190_v30, %v106_v24 }
 0x13b   :  { %353 = vtanh.f32 %v183_v27 }
 0x13c   :  { %355 = vtanh.f32 %v185_v31 }
 0x13d   :  { %357 = vtanh.f32 %v189_v29 }
 0x13e   :  { %359 = vtanh.f32 %v191_v32 }
 0x145   :  { %v354_v36 = vpop.eup %353 }
 0x146   :  { %v356_v37 = vpop.eup %355  ;;  %v209_v41 = vmul.f32 %v354_v36, %v202_v35 }
 0x147   :  { %v358_v38 = vpop.eup %357  ;;  %v210_v39 = vmul.f32 %v356_v37, %v206_v34 }
 0x148   :  { %v360_v40 = vpop.eup %359  ;;  %v211_v42 = vmul.f32 %v358_v38, %v202_v35 }
 0x149   :  { %v214_v43 = vsel %vm213_vm1, %v210_v39, 0.0  ;;  %v212_v44 = vmul.f32 %v360_v40, %v206_v34 }
 0x14a   :  { %v215_v45 = vadd.f32 %v214_v43, %v209_v41 }
 0x14b   :  { %v218_v46 = vsel %vm213_vm1, %v212_v44, 0.0 }
 0x14c   :  { %216 = vadd.xlane.f32.xlu0 %v215_v45  ;;  %v219_v47 = vadd.f32 %v218_v46, %v211_v42 }
 0x150   :  { %220 = vadd.xlane.f32.xlu0 %v219_v47 }
 0x1d9   :  { %v217_v50 = vpop.xlane.xlu0 %216 }
 0x1da   :  { %v224_v51 = vadd.f32 %v223_v49, %v217_v50 }
 0x1dc   :  { %v226_v52 = vmul.f32 1.442695, %v224_v51 }
 0x1dd   :  { %v221_v53 = vpop.xlane.xlu0 %220 }
 0x1de   :  { %361 = vpow2.f32 %v226_v52  ;;  %v225_v54 = vadd.f32 %v223_v49, %v221_v53 }
 0x1e0   :  { %v228_v55 = vmul.f32 1.442695, %v225_v54 }
 0x1e2   :  { %363 = vpow2.f32 %v228_v55 }
 0x1e8   :  { %v362_v57 = vpop.eup %361 }
 0x1e9   :  { %v248_v58 = vmul.f32 %v362_v57, %v238_v56 }
 0x1eb   :  { %253 = vperm.xlu0 %351, %v248_v58  }
 0x1ec   :  { %v364_v60 = vpop.eup %363 }
 0x1ed   :  { %v249_v61 = vmul.f32 %v364_v60, %v245_v59 }
 0x1ef   :  { %256 = vperm.xlu1 %352, %v249_v61  }
 0x26a   :  { %v254_v0 = vpop.permute.xlu0 %253 }
 0x26b   :  { %v263_v2 = vrot.slane %v254_v0, %v262_v63  ;;  %v279_v7 = vmul.f32 %v254_v0, %v614_v13 }
 0x26d   :  { %v281_v9 = vsel %vm109_vm0, %v279_v7, 0.0 }
 0x26e   :  { %v257_v1 = vpop.permute.xlu1 %256  ;;  %v282_v11 = vrot.slane %v281_v9, 4 }
 0x26f   :  { %v267_v3 = vrot.slane %v257_v1, %v262_v63  ;;  %v280_v6 = vmul.f32 %v257_v1, %v616_v14 }
 0x270   :  { %v283_v15 = vadd.f32 %v282_v11, %v281_v9 }
 0x271   :  { %v269_v4 = vsel %vm268_vm2, %v267_v3, %v263_v2  ;;  %v288_v8 = vsel %vm109_vm0, %v280_v6, 0.0 }
 0x272   :  { %v272_v5 = vsel %vm271_vm3, %v269_v4, 0.0  ;;  %v289_v10 = vrot.slane %v288_v8, 4  ;;  %v284_v19 = vrot.slane %v283_v15, 2 }
 0x273   :  { %273 = vadd.xlane.f32.xlu1 %v272_v5 }
 0x274   :  { %v290_v12 = vadd.f32 %v289_v10, %v288_v8  ;;  %v285_v21 = vadd.f32 %v284_v19, %v283_v15 }
 0x276   :  { %v291_v18 = vrot.slane %v290_v12, 2  ;;  %v286_v23 = vrot.slane %v285_v21, 1 }
 0x278   :  { %v292_v20 = vadd.f32 %v291_v18, %v290_v12  ;;  %v287_v25 = vadd.f32 %v286_v23, %v285_v21 }
 0x27a   :  { %v293_v22 = vrot.slane %v292_v20, 1 }
 0x27c   :  { %v294_v24 = vadd.f32 %v293_v22, %v292_v20 }
 0x300   :  { %v274_v16 = vpop.xlane.xlu1 %273 }
 0x301   :  { %v275_v17 = vadd.f32 1e-08, %v274_v16 }
 0x303   :  { %365 = vrcp.f32 %v275_v17 }
 0x30d   :  { %v366_v14 = vpop.eup %365 }
 0x30e   :  { %v296_v13 = vrot.slane %v366_v14, 1  ;;  %v299_v27 = vmul.f32 %v366_v14, %v287_v25 }
 0x310   :  { %v300_v26 = vmul.f32 %v296_v13, %v294_v24 }
 0x312   :  { %v303_v28 = vrot.slane %v300_v26, 7 }
 0x314   :  { %v304_v29 = vsel %vm268_vm2, %v303_v28, %v299_v27 }
 0x315   :  { %307 = vst.msk [vmem:[#allocation12] sm:$0x3] %vm306_vm4, %v304_v29 }
 0x316   :  { %488 = shalt.err (!%p485_p2)
}
 0x317   :  { %s489_s12 = scalar_lea.hbm %s649_s6, 32 }
 0x318   :  { %p490_p3 = scmp.ne.s32.totalorder %s649_s6, %s489_s12  ;;  %p493_p4 = scmp.lt.u32.totalorder %s489_s12, %s649_s6 }
 0x31a   :  { %p495_p5 = pnand %p493_p4, %p490_p3 }
 0x31c   :  { %498 = shalt.err (!%p495_p5)
}
 0x31d   :  { %317 = dma.vmem_to_hbm [thread:$0]  %s315_s8, 32, %s649_s6, [#allocation5]  }
 0x31e   :  { %505 = dma.done.wait [#allocation5], 32  }
 0x31f   :  { %506 = vsyncadd [#allocation5], 4294967264 }
 0x320   :  { %321 = vsyncpa [#allocation4], 1 }
 0x321   :  { %322 = vsyncpa [#allocation7], 1 }
 0x322   :  { %323 = vsyncpa [#allocation10], 1 }
 0x323   :  { %324 = vsyncpa [#allocation5], 1 }

</bundles_post_ra>
